<compile_context>
chip_gen: v7x
topology: tpu7x:2x2x1
jax: 0.10.0
libtpu: 0.0.40
codegen_flags: <defaults>
</compile_context>

<pallas_src>
from typing import NamedTuple

import jax
import jax.numpy as jnp
from jax.experimental import pallas as pl
from jax.experimental.pallas import tpu as pltpu

_LANE = 128
_BF16_SUBLANE = 16
_MXU_ROWS = 256

# Whether pl.BlockSpec(pipeline_mode=pl.Buffered(1)) is supported by this JAX
# version / lowering path (probed lazily on first call).
_SINGLE_BUFFER_WEIGHTS_OK = None


def _round_up(x, m):
    return ((x + m - 1) // m) * m


def _head_kernel(x_ref, w1_ref, b1_ref, w2_ref, b2_ref, o_ref):
    # In-kernel cast to the weight dtype (bf16): VPU cast hides under the MXU
    # and avoids a separate wrapper-side HBM cast/pad pass over the batch.
    x = x_ref[...].astype(w1_ref.dtype)
    # dense: [TB,H] @ [H,H], f32 accumulation on the MXU.
    h = jnp.dot(x, w1_ref[...], preferred_element_type=jnp.float32)
    h = jnp.tanh(h + b1_ref[...])          # f32 bias add (VPU) + tanh (EUP)
    # out_proj: [TB,H] @ [H,Lp], f32 accumulation. h is re-quantized to bf16
    # for MXU rate; keep it f32 here instead if logit fidelity is paramount.
    out = jnp.dot(h.astype(w2_ref.dtype), w2_ref[...],
                  preferred_element_type=jnp.float32)
    o_ref[...] = (out + b2_ref[...]).astype(o_ref.dtype)
    # TODO(synk): dropout is identity at inference; training-mode dropout
    # (pltpu.prng_random_bits masking) intentionally not implemented.


class HeadParams(NamedTuple):
    w1: jax.Array       # [H, H]  param_dtype (in, out)
    b1: jax.Array       # [1, H]  f32
    w2: jax.Array       # [H, Lp] param_dtype, labels zero-padded to 128 lanes
    b2: jax.Array       # [1, Lp] f32
    num_labels: int     # true L (pre-padding)


def prepare_head_params(w_dense, b_dense, w_out, b_out,
                        param_dtype=jnp.bfloat16):
    """One-time weight prep (hoisted out of the per-call path): bf16 cast,
    128-lane padding of out_proj, bias reshape to [1, N]."""
    H, L = w_out.shape
    Lp = _round_up(L, _LANE)
    w2, b2 = w_out, b_out
    if Lp != L:
        w2 = jnp.pad(w2, ((0, 0), (0, Lp - L)))
        b2 = jnp.pad(b2, ((0, Lp - L),))
    return HeadParams(
        w1=w_dense.astype(param_dtype),
        b1=b_dense.reshape(1, H).astype(jnp.float32),
        w2=w2.astype(param_dtype),
        b2=b2.reshape(1, Lp).astype(jnp.float32),
        num_labels=L,
    )


def _device_kind():
    try:
        return jax.devices()[0].device_kind.lower()
    except Exception:
        return ""


def _choose_batch_tile(B, tile_b, two_core):
    """Biggest MXU-friendly batch tile <= tile_b covering B; on 2-TC chips aim
    for an even (>=2) number of grid steps so both TensorCores get work."""
    def aligned(v):
        a = _MXU_ROWS if v >= _MXU_ROWS else (_LANE if v >= _LANE else _BF16_SUBLANE)
        return _round_up(v, a)

    tb = aligned(min(tile_b, B))
    n = pl.cdiv(B, tb)
    if two_core and B > _BF16_SUBLANE and (n < 2 or n % 2):
        target = 2 if n <= 2 else n + 1
        per = pl.cdiv(B, target)
        tb = _round_up(per, _LANE if per >= _LANE else _BF16_SUBLANE)
        n = pl.cdiv(B, tb)
    return tb, n


def wav2vec2_classification_head(features, params: HeadParams, *, tile_b=1024):
    """features: [B, H]; params from prepare_head_params(). Returns [B, L]."""
    global _SINGLE_BUFFER_WEIGHTS_OK

    B, H = features.shape
    Lp = params.w2.shape[1]
    L = params.num_labels
    out_dtype = features.dtype

    kind = _device_kind()
    two_core = any(t in kind for t in ("v7", "v4", "v5p"))
    TB, num_tiles = _choose_batch_tile(B, tile_b, two_core)

    x_sz = features.dtype.itemsize
    p_sz = params.w1.dtype.itemsize
    o_sz = out_dtype.itemsize
    vmem_cap = (48 << 20) if "v7" in kind else (100 << 20)

    def build_and_run(single_buffer_weights):
        wkw = ({"pipeline_mode": pl.Buffered(1)} if single_buffer_weights else {})
        wbuf = 1 if single_buffer_weights else 2
        # Accurate VMEM budget: double-buffered activation/output tiles,
        # resident weights (x1 single-buffered / x2 default), plus in-kernel
        # temporaries; +4 MiB compiler-scratch margin, generation-aware cap.
        vmem_need = (
            2 * TB * H * x_sz                      # x tiles (double-buffered)
            + 2 * TB * Lp * o_sz                   # output tiles
            + wbuf * ((H * H + H * Lp) * p_sz      # W1 + W2 (resident)
                      + (H + Lp) * 4)              # biases (f32)
            + TB * (H * (4 + 2 * p_sz) + Lp * 4))  # x cast, h f32/bf16, out f32
        vmem_limit = int(min(max(vmem_need + (4 << 20), 32 << 20), vmem_cap))
        cost = pl.CostEstimate(
            flops=2 * num_tiles * TB * H * (H + Lp),
            transcendentals=num_tiles * TB * H,
            bytes_accessed=int(B * H * x_sz + (H * H + H * Lp) * p_sz
                               + (H + Lp) * 4 + B * Lp * o_sz))
        return pl.pallas_call(
            _head_kernel,
            out_shape=jax.ShapeDtypeStruct((B, Lp), out_dtype),
            grid=(num_tiles,),
            in_specs=[
                pl.BlockSpec((TB, H), lambda i: (i, 0)),         # x streams over B
                pl.BlockSpec((H, H), lambda i: (0, 0), **wkw),   # W1 resident
                pl.BlockSpec((1, H), lambda i: (0, 0), **wkw),   # b1 resident
                pl.BlockSpec((H, Lp), lambda i: (0, 0), **wkw),  # W2 resident
                pl.BlockSpec((1, Lp), lambda i: (0, 0), **wkw),  # b2 resident
            ],
            out_specs=pl.BlockSpec((TB, Lp), lambda i: (i, 0)),
            compiler_params=pltpu.CompilerParams(
                dimension_semantics=("parallel",),
                vmem_limit_bytes=vmem_limit),
            cost_estimate=cost,
        )(features, params.w1, params.b1, params.w2, params.b2)

    if _SINGLE_BUFFER_WEIGHTS_OK is None:
        try:
            out_padded = build_and_run(True)
            _SINGLE_BUFFER_WEIGHTS_OK = True
        except Exception:
            # pipeline_mode / Buffered(1) unsupported on this JAX version:
            # fall back to default double-buffered resident weights.
            _SINGLE_BUFFER_WEIGHTS_OK = False
            out_padded = build_and_run(False)
    else:
        out_padded = build_and_run(_SINGLE_BUFFER_WEIGHTS_OK)

    return out_padded[:, :L] if Lp != L else out_padded


if __name__ == "__main__":
    # Small synthetic config consistent with the module: hidden_size=32,
    # num_labels=8, batch=2 (real deployments use H=768/1024 and large B).
    B, H, L = 2, 32, 8
    key = jax.random.PRNGKey(0)
    k_x, k_w1, k_b1, k_w2, k_b2 = jax.random.split(key, 5)

    features = jax.random.normal(k_x, (B, H), dtype=jnp.float32)
    # Deterministic parameter init (Kaiming-ish uniform scale like nn.Linear).
    w_dense = jax.random.uniform(k_w1, (H, H), jnp.float32, -1.0, 1.0) / jnp.sqrt(H)
    b_dense = jax.random.uniform(k_b1, (H,), jnp.float32, -1.0, 1.0) / jnp.sqrt(H)
    w_out = jax.random.uniform(k_w2, (H, L), jnp.float32, -1.0, 1.0) / jnp.sqrt(H)
    b_out = jax.random.uniform(k_b2, (L,), jnp.float32, -1.0, 1.0) / jnp.sqrt(H)

    # Weight prep hoisted out of the per-call path (done once).
    params = prepare_head_params(w_dense, b_dense, w_out, b_out)

    out = wav2vec2_classification_head(features, params)
    out = jax.block_until_ready(out)
    assert out.shape == (B, L)

    # Reference applying the same bf16 rounding the kernel uses (f32 accumulate).
    def _bf16(a):
        return a.astype(jnp.bfloat16).astype(jnp.float32)

    h_ref = jnp.tanh(_bf16(features) @ _bf16(w_dense) + b_dense)
    ref = _bf16(h_ref) @ _bf16(w_out) + b_out
    assert jnp.allclose(out, ref, atol=2e-3, rtol=2e-3), "mismatch vs bf16 reference"

    # Loose sanity check against the pure-f32 reference (bf16 quantization noise).
    ref_f32 = jnp.tanh(features @ w_dense + b_dense) @ w_out + b_out
    assert jnp.allclose(out, ref_f32, atol=5e-2, rtol=5e-2), "mismatch vs f32 reference"

    print("KERNEL_OK")
</pallas_src>

<mosaic_0001>
module attributes {stable_mosaic.version = 11 : i64} {
  func.func @_head_kernel(%arg0: i32, %arg1: memref<16x32xf32, #tpu.memory_space<vmem>>, %arg2: memref<32x32xbf16, #tpu.memory_space<vmem>>, %arg3: memref<1x32xf32, #tpu.memory_space<vmem>>, %arg4: memref<32x128xbf16, #tpu.memory_space<vmem>>, %arg5: memref<1x128xf32, #tpu.memory_space<vmem>>, %arg6: memref<16x128xf32, #tpu.memory_space<vmem>>) attributes {dimension_semantics = [#tpu.dimension_semantics<parallel>], iteration_bounds = array<i64: 1>, scalar_prefetch = 0 : i64, scratch_operands = 0 : i64, tpu.core_type = #tpu.core_type<tc>, window_params = [{transform_indices = @transform_0, window_bounds = array<i64: 16, 32>}, {pipeline_mode = #tpu.pipeline_mode<synchronous>, transform_indices = @transform_1, window_bounds = array<i64: 32, 32>}, {pipeline_mode = #tpu.pipeline_mode<synchronous>, transform_indices = @transform_2, window_bounds = array<i64: 1, 32>}, {pipeline_mode = #tpu.pipeline_mode<synchronous>, transform_indices = @transform_3, window_bounds = array<i64: 32, 128>}, {pipeline_mode = #tpu.pipeline_mode<synchronous>, transform_indices = @transform_4, window_bounds = array<i64: 1, 128>}, {transform_indices = @transform_5, window_bounds = array<i64: 16, 128>}]} {
    %c0 = arith.constant 0 : index
    %c0_0 = arith.constant 0 : index
    %0 = vector.load %arg1[%c0, %c0_0] : memref<16x32xf32, #tpu.memory_space<vmem>>, vector<16x32xf32>
    %1 = arith.truncf %0 : vector<16x32xf32> to vector<16x32xbf16>
    %c0_1 = arith.constant 0 : index
    %c0_2 = arith.constant 0 : index
    %2 = vector.load %arg2[%c0_1, %c0_2] : memref<32x32xbf16, #tpu.memory_space<vmem>>, vector<32x32xbf16>
    %cst = arith.constant dense<0.000000e+00> : vector<16x32xf32>
    %3 = tpu.matmul %1, %2, %cst {dimension_numbers = #tpu.dot_dimension_numbers<[1], [0], [0], [1], [0, 0, 1, 1], [], []>} : vector<16x32xbf16>, vector<32x32xbf16>, vector<16x32xf32> -> vector<16x32xf32>
    %c0_3 = arith.constant 0 : index
    %c0_4 = arith.constant 0 : index
    %4 = vector.load %arg3[%c0_3, %c0_4] : memref<1x32xf32, #tpu.memory_space<vmem>>, vector<1x32xf32>
    %5 = vector.broadcast %4 : vector<1x32xf32> to vector<16x32xf32>
    %6 = arith.addf %3, %5 : vector<16x32xf32>
    %7 = math.tanh %6 : vector<16x32xf32>
    %8 = arith.truncf %7 : vector<16x32xf32> to vector<16x32xbf16>
    %c0_5 = arith.constant 0 : index
    %c0_6 = arith.constant 0 : index
    %9 = vector.load %arg4[%c0_5, %c0_6] : memref<32x128xbf16, #tpu.memory_space<vmem>>, vector<32x128xbf16>
    %cst_7 = arith.constant dense<0.000000e+00> : vector<16x128xf32>
    %10 = tpu.matmul %8, %9, %cst_7 {dimension_numbers = #tpu.dot_dimension_numbers<[1], [0], [0], [1], [0, 0, 1, 1], [], []>} : vector<16x32xbf16>, vector<32x128xbf16>, vector<16x128xf32> -> vector<16x128xf32>
    %c0_8 = arith.constant 0 : index
    %c0_9 = arith.constant 0 : index
    %11 = vector.load %arg5[%c0_8, %c0_9] : memref<1x128xf32, #tpu.memory_space<vmem>>, vector<1x128xf32>
    %12 = vector.broadcast %11 : vector<1x128xf32> to vector<16x128xf32>
    %13 = arith.addf %10, %12 : vector<16x128xf32>
    %c0_10 = arith.constant 0 : index
    %c0_11 = arith.constant 0 : index
    %14 = vector.load %arg6[%c0_10, %c0_11] : memref<16x128xf32, #tpu.memory_space<vmem>>, vector<16x128xf32>
    tpu.vector_store %arg6[%c0_10, %c0_11], %13 {strides = array<i32>} : memref<16x128xf32, #tpu.memory_space<vmem>>, vector<16x128xf32>,
    return
  }
  func.func @transform_0(%arg0: i32) -> (i32, i32) {
    %c0_i32 = arith.constant 0 : i32
    %c0_i32_0 = arith.constant 0 : i32
    return %arg0, %c0_i32 : i32, i32
  }
  func.func @transform_1(%arg0: i32) -> (i32, i32) {
    %c0_i32 = arith.constant 0 : i32
    %c0_i32_0 = arith.constant 0 : i32
    %c0_i32_1 = arith.constant 0 : i32
    return %c0_i32, %c0_i32_0 : i32, i32
  }
  func.func @transform_2(%arg0: i32) -> (i32, i32) {
    %c0_i32 = arith.constant 0 : i32
    %c0_i32_0 = arith.constant 0 : i32
    %c0_i32_1 = arith.constant 0 : i32
    return %c0_i32, %c0_i32_0 : i32, i32
  }
  func.func @transform_3(%arg0: i32) -> (i32, i32) {
    %c0_i32 = arith.constant 0 : i32
    %c0_i32_0 = arith.constant 0 : i32
    %c0_i32_1 = arith.constant 0 : i32
    return %c0_i32, %c0_i32_0 : i32, i32
  }
  func.func @transform_4(%arg0: i32) -> (i32, i32) {
    %c0_i32 = arith.constant 0 : i32
    %c0_i32_0 = arith.constant 0 : i32
    %c0_i32_1 = arith.constant 0 : i32
    return %c0_i32, %c0_i32_0 : i32, i32
  }
  func.func @transform_5(%arg0: i32) -> (i32, i32) {
    %c0_i32 = arith.constant 0 : i32
    %c0_i32_0 = arith.constant 0 : i32
    return %arg0, %c0_i32 : i32, i32
  }
}

module attributes {stable_mosaic.version = 11 : i64} {
  func.func @_head_kernel(%arg0: i32, %arg1: memref<16x32xf32, #tpu.memory_space<vmem>>, %arg2: memref<32x32xbf16, #tpu.memory_space<vmem>>, %arg3: memref<1x32xf32, #tpu.memory_space<vmem>>, %arg4: memref<32x128xbf16, #tpu.memory_space<vmem>>, %arg5: memref<1x128xf32, #tpu.memory_space<vmem>>, %arg6: memref<16x128xf32, #tpu.memory_space<vmem>>) attributes {dimension_semantics = [#tpu.dimension_semantics<parallel>], iteration_bounds = array<i64: 1>, scalar_prefetch = 0 : i64, scratch_operands = 0 : i64, tpu.core_type = #tpu.core_type<tc>, window_params = [{transform_indices = @transform_0, window_bounds = array<i64: 16, 32>}, {pipeline_mode = #tpu.pipeline_mode<synchronous>, transform_indices = @transform_1, window_bounds = array<i64: 32, 32>}, {pipeline_mode = #tpu.pipeline_mode<synchronous>, transform_indices = @transform_2, window_bounds = array<i64: 1, 32>}, {pipeline_mode = #tpu.pipeline_mode<synchronous>, transform_indices = @transform_3, window_bounds = array<i64: 32, 128>}, {pipeline_mode = #tpu.pipeline_mode<synchronous>, transform_indices = @transform_4, window_bounds = array<i64: 1, 128>}, {transform_indices = @transform_5, window_bounds = array<i64: 16, 128>}]} {
    %c0 = arith.constant 0 : index
    %c0_0 = arith.constant 0 : index
    %0 = vector.load %arg1[%c0, %c0_0] : memref<16x32xf32, #tpu.memory_space<vmem>>, vector<16x32xf32>
    %1 = arith.truncf %0 : vector<16x32xf32> to vector<16x32xbf16>
    %c0_1 = arith.constant 0 : index
    %c0_2 = arith.constant 0 : index
    %2 = vector.load %arg2[%c0_1, %c0_2] : memref<32x32xbf16, #tpu.memory_space<vmem>>, vector<32x32xbf16>
    %cst = arith.constant dense<0.000000e+00> : vector<16x32xf32>
    %3 = tpu.matmul %1, %2, %cst {dimension_numbers = #tpu.dot_dimension_numbers<[1], [0], [0], [1], [0, 0, 1, 1], [], []>} : vector<16x32xbf16>, vector<32x32xbf16>, vector<16x32xf32> -> vector<16x32xf32>
    %c0_3 = arith.constant 0 : index
    %c0_4 = arith.constant 0 : index
    %4 = vector.load %arg3[%c0_3, %c0_4] : memref<1x32xf32, #tpu.memory_space<vmem>>, vector<1x32xf32>
    %5 = vector.broadcast %4 : vector<1x32xf32> to vector<16x32xf32>
    %6 = arith.addf %3, %5 : vector<16x32xf32>
    %7 = math.tanh %6 : vector<16x32xf32>
    %8 = arith.truncf %7 : vector<16x32xf32> to vector<16x32xbf16>
    %c0_5 = arith.constant 0 : index
    %c0_6 = arith.constant 0 : index
    %9 = vector.load %arg4[%c0_5, %c0_6] : memref<32x128xbf16, #tpu.memory_space<vmem>>, vector<32x128xbf16>
    %cst_7 = arith.constant dense<0.000000e+00> : vector<16x128xf32>
    %10 = tpu.matmul %8, %9, %cst_7 {dimension_numbers = #tpu.dot_dimension_numbers<[1], [0], [0], [1], [0, 0, 1, 1], [], []>} : vector<16x32xbf16>, vector<32x128xbf16>, vector<16x128xf32> -> vector<16x128xf32>
    %c0_8 = arith.constant 0 : index
    %c0_9 = arith.constant 0 : index
    %11 = vector.load %arg5[%c0_8, %c0_9] : memref<1x128xf32, #tpu.memory_space<vmem>>, vector<1x128xf32>
    %12 = vector.broadcast %11 : vector<1x128xf32> to vector<16x128xf32>
    %13 = arith.addf %10, %12 : vector<16x128xf32>
    %c0_10 = arith.constant 0 : index
    %c0_11 = arith.constant 0 : index
    %14 = vector.load %arg6[%c0_10, %c0_11] : memref<16x128xf32, #tpu.memory_space<vmem>>, vector<16x128xf32>
    tpu.vector_store %arg6[%c0_10, %c0_11], %13 {strides = array<i32>} : memref<16x128xf32, #tpu.memory_space<vmem>>, vector<16x128xf32>,
    return
  }
  func.func @transform_0(%arg0: i32) -> (i32, i32) {
    %c0_i32 = arith.constant 0 : i32
    %c0_i32_0 = arith.constant 0 : i32
    return %arg0, %c0_i32 : i32, i32
  }
  func.func @transform_1(%arg0: i32) -> (i32, i32) {
    %c0_i32 = arith.constant 0 : i32
    %c0_i32_0 = arith.constant 0 : i32
    %c0_i32_1 = arith.constant 0 : i32
    return %c0_i32, %c0_i32_0 : i32, i32
  }
  func.func @transform_2(%arg0: i32) -> (i32, i32) {
    %c0_i32 = arith.constant 0 : i32
    %c0_i32_0 = arith.constant 0 : i32
    %c0_i32_1 = arith.constant 0 : i32
    return %c0_i32, %c0_i32_0 : i32, i32
  }
  func.func @transform_3(%arg0: i32) -> (i32, i32) {
    %c0_i32 = arith.constant 0 : i32
    %c0_i32_0 = arith.constant 0 : i32
    %c0_i32_1 = arith.constant 0 : i32
    return %c0_i32, %c0_i32_0 : i32, i32
  }
  func.func @transform_4(%arg0: i32) -> (i32, i32) {
    %c0_i32 = arith.constant 0 : i32
    %c0_i32_0 = arith.constant 0 : i32
    %c0_i32_1 = arith.constant 0 : i32
    return %c0_i32, %c0_i32_0 : i32, i32
  }
  func.func @transform_5(%arg0: i32) -> (i32, i32) {
    %c0_i32 = arith.constant 0 : i32
    %c0_i32_0 = arith.constant 0 : i32
    return %arg0, %c0_i32 : i32, i32
  }
}

</mosaic_0001>

<bundles_post_ra>
// kernel: tpu_custom_call.1
= control target key start
LH: loop header
LB: loop body
LE: loop exit
PB: predicated region body
PF: predicated region fallthrough
CT: control target
= control target key end

     0   :  { %10 = vsyncpa [#allocation3], 0  ;;  %s474_s0 = inlined_call_operand.hbm [shape: f32[2,32], index: 0, kind: input, shape index: {}]   ;;  %s475_s1 = inlined_call_operand.hbm [shape: bf16[32,32], index: 1, kind: input, shape index: {}]   ;;  %s476_s2 = inlined_call_operand.vmem [shape: f32[1,32], index: 2, kind: input, shape index: {}]   ;;  %s477_s3 = inlined_call_operand.hbm [shape: bf16[32,128], index: 3, kind: input, shape index: {}]   ;;  %s478_s4 = inlined_call_operand.vmem [shape: f32[1,128], index: 4, kind: input, shape index: {}]   ;;  %s479_s5 = inlined_call_operand.hbm [shape: f32[2,128], index: 5, kind: output, shape index: {}]  }
   0x1   :  { %11 = vsyncpa [#allocation6], 0 }
   0x2   :  { %12 = vsyncpa [#allocation4], 0 }
   0x3   :  { %17 = vsyncadd [#allocation3], 224  ;;  %s366_s18 = smov [#allocation5]   ;;  %s272_s22 = scalar_lea.hbm %s475_s1, 256 }
   0x4   :  { %s30_s19 = sshll.u32 %s366_s18, 4  ;;  %p273_p0 = scmp.ne.s32.totalorder %s475_s1, %s272_s22  ;;  %s31_s19 = int_to_ptr.vmem [resolvable:$true] %s30_s19 }
   0x5   :  { %p276_p1 = scmp.lt.u32.totalorder %s272_s22, %s475_s1 }
   0x7   :  { %p278_p2 = pnand %p276_p1, %p273_p0 }
   0x9   :  { %281 = shalt.err (!%p278_p2)
}
   0xa   :  { %s282_s27 = scalar_lea.vmem %s31_s19, 256  ;;  %p287_p4 = scmp.lt.s32.totalorder %s31_s19, %s31_s19 }
   0xb   :  { %p283_p3 = scmp.ne.s32.totalorder %s31_s19, %s282_s27  ;;  %p288_p5 = scmp.lt.s32.totalorder %s282_s27, %s282_s27 }
   0xd   :  { %p289_p6 = por %p288_p5, %p287_p4 }
   0xf   :  { %p290_p7 = pnand %p289_p6, %p283_p3 }
  0x11   :  { %293 = shalt.err (!%p290_p7)
}
  0x12   :  { %s367_s28 = smov 64   ;;  %s368_s29 = smov 4  }
  0x13   :  { %36 = dma.hbm_to_vmem [thread:$0]  %s475_s1, 256, %s31_s19, [#allocation6], %s367_s28, %s367_s28, %s368_s29  }
  0x14   :  { %s369_s7 = smov [#allocation2]   ;;  %s294_s11 = scalar_lea.hbm %s474_s0, 32 }
  0x15   :  { %s18_s8 = sshll.u32 %s369_s7, 4  ;;  %p295_p8 = scmp.ne.s32.totalorder %s474_s0, %s294_s11  ;;  %s19_s8 = int_to_ptr.vmem [resolvable:$true] %s18_s8 }
  0x16   :  { %p298_p9 = scmp.lt.u32.totalorder %s294_s11, %s474_s0 }
  0x18   :  { %p300_p10 = pnand %p298_p9, %p295_p8 }
  0x1a   :  { %303 = shalt.err (!%p300_p10)
}
  0x1b   :  { %s304_s16 = scalar_lea.vmem %s19_s8, 32  ;;  %s308_s1 = scalar_lea.vmem %s19_s8, 256 }
  0x1c   :  { %p305_p11 = scmp.ne.s32.totalorder %s19_s8, %s304_s16  ;;  %p309_p12 = scmp.lt.s32.totalorder %s19_s8, %s19_s8 }
  0x1d   :  { %p310_p13 = scmp.lt.s32.totalorder %s308_s1, %s304_s16 }
  0x1f   :  { %p311_p0 = por %p310_p13, %p309_p12 }
  0x21   :  { %p312_p1 = pnand %p311_p0, %p305_p11 }
  0x23   :  { %315 = shalt.err (!%p312_p1)
}
  0x24   :  { %s370_s17 = smov 32   ;;  %s371_s18 = smov 2  }
  0x25   :  { %24 = dma.hbm_to_vmem [thread:$0]  %s474_s0, 32, %s19_s8, [#allocation3], %s370_s17, %s370_s17, %s371_s18  }
  0x26   :  { %s372_s21 = smov [#allocation7]   ;;  %s316_s25 = scalar_lea.hbm %s477_s3, 256 }
  0x27   :  { %s44_s22 = sshll.u32 %s372_s21, 4  ;;  %p317_p2 = scmp.ne.s32.totalorder %s477_s3, %s316_s25  ;;  %s45_s22 = int_to_ptr.vmem [resolvable:$true] %s44_s22 }
  0x28   :  { %p320_p3 = scmp.lt.u32.totalorder %s316_s25, %s477_s3 }
  0x2a   :  { %p322_p4 = pnand %p320_p3, %p317_p2 }
  0x2c   :  { %325 = shalt.err (!%p322_p4)
}
  0x2d   :  { %s326_s7 = scalar_lea.vmem %s45_s22, 256  ;;  %p331_p6 = scmp.lt.s32.totalorder %s45_s22, %s45_s22 }
  0x2e   :  { %p327_p5 = scmp.ne.s32.totalorder %s45_s22, %s326_s7  ;;  %p332_p7 = scmp.lt.s32.totalorder %s326_s7, %s326_s7 }
  0x30   :  { %p333_p8 = por %p332_p7, %p331_p6 }
  0x32   :  { %p334_p9 = pnand %p333_p8, %p327_p5 }
  0x34   :  { %337 = shalt.err (!%p334_p9)
}
  0x35   :  { %50 = dma.hbm_to_vmem [thread:$0]  %s477_s3, 256, %s45_s22, [#allocation6], %s367_s28, %s367_s28, %s368_s29  }
  0x36   :  { %360 = dma.done.wait [#allocation3], 256  }
  0x37   :  { %361 = vsyncadd [#allocation3], 4294967040 }
  0x38   :  { %362 = dma.done.wait [#allocation6], 512  }
  0x39   :  { %363 = vsyncadd [#allocation6], 4294966784  ;;  %v373_v0 = vmov 0.0   ;;  %vm374_vm0 = vmmov 0   ;;  %v264_v1 = vld [vmem:[#allocation5] sm:$0xff]   ;;  %v265_v2 = vld [vmem:[#allocation5 + $0x8] sm:$0xff]  }
  0x3a   :  { %238 = vmatprep.subr.bf16.mxu0 %v373_v0  ;;  %242 = vmatprep.mubr.msk.bf16.mxu0 %vm374_vm0, %v373_v0  ;;  %v63_v3 = vld [vmem:[#allocation2] sm:$0xff]  ;;  %v64_v4 = vld [vmem:[#allocation2 + $0x8] sm:$0xff]  ;;  %vm89_vm1 = vcmask 261120  }
  0x3b   :  { %246 = vmatprep.subr.bf16.mxu1 %v373_v0  ;;  %250 = vmatprep.mubr.msk.bf16.mxu1 %vm374_vm0, %v373_v0  ;;  %v65_v5 = vpack.c.bf16 %v64_v4, %v63_v3  ;;  %v266_v6 = vld [vmem:[#allocation7] sm:$0xff]   ;;  %v267_v7 = vld [vmem:[#allocation7 + $0x8] sm:$0xff]  }
  0x3c   :  { %239 = vmatpush3.bf16.msra.mxu0 %v264_v1  ;;  %247 = vmatpush3.bf16.msra.mxu1 %v266_v6  ;;  %v224_v8 = vld [vmem:[%s476_s2] ss:$0 sm:$0xff] }
  0x3d   :  { %240 = vmatprep.subr.bf16.mxu0 %v373_v0  ;;  %248 = vmatprep.subr.bf16.mxu1 %v373_v0  ;;  %v228_v18 = vld [vmem:[%s478_s4] ss:$0 sm:$0xff] }
  0x40   :  { %241 = vmatpush3.bf16.msra.mxu0 %v265_v2  ;;  %249 = vmatpush3.bf16.msra.mxu1 %v267_v7 }
  0x43   :  { %243 = vmatmul.mubr.msk.bf16.vlgmr.msra.gmra.mrb[0].mxu0 %vm89_vm1, %v65_v5 }
 0x116   :  { %v127_v9 = vpop.f32.mrb[0].mxu0 }
 0x117   :  { %v128_v10 = vadd.f32 %v224_v8, %v127_v9  ;;  %v244_v11 = vpop.f32.mrb[1].mxu0 }
 0x118   :  { %v130_v12 = vpop.f32.mrb[2].mxu0 }
 0x119   :  { %v131_v13 = vadd.f32 %v224_v8, %v130_v12  ;;  %v245_v14 = vpop.f32.mrb[3].mxu0  ;;  %268 = vtanh.f32 %v128_v10 }
 0x11b   :  { %270 = vtanh.f32 %v131_v13 }
 0x123   :  { %v269_v15 = vpop.eup %268 }
 0x125   :  { %v271_v16 = vpop.eup %270 }
 0x126   :  { %v136_v17 = vpack.c.bf16 %v271_v16, %v269_v15 }
 0x128   :  { %251 = vmatmul.mubr.msk.bf16.vlgmr.msra.gmra.mrb[0].mxu1 %vm89_vm1, %v136_v17 }
 0x1fb   :  { %v197_v19 = vpop.f32.mrb[0].mxu1 }
 0x1fc   :  { %v198_v20 = vadd.f32 %v228_v18, %v197_v19  ;;  %v252_v21 = vpop.f32.mrb[1].mxu1 }
 0x1fd   :  { %v200_v22 = vpop.f32.mrb[2].mxu1 }
 0x1fe   :  { %204 = vst [vmem:[#allocation8] sm:$0xff] %v198_v20  ;;  %v201_v23 = vadd.f32 %v228_v18, %v200_v22  ;;  %v253_v24 = vpop.f32.mrb[3].mxu1 }
 0x200   :  { %205 = vst [vmem:[#allocation8 + $0x8] sm:$0xff] %v201_v23 }
 0x201   :  { %210 = vsyncadd [#allocation4], 224  ;;  %s375_s2 = smov [#allocation8]  }
 0x202   :  { %s211_s10 = sshll.u32 %s375_s2, 4  ;;  %s212_s10 = int_to_ptr.vmem [resolvable:$true] %s211_s10 }
 0x203   :  { %s338_s11 = scalar_lea.vmem %s212_s10, 32  ;;  %s342_s12 = scalar_lea.vmem %s212_s10, 256 }
 0x204   :  { %p339_p10 = scmp.ne.s32.totalorder %s212_s10, %s338_s11  ;;  %p343_p11 = scmp.lt.s32.totalorder %s212_s10, %s212_s10 }
 0x205   :  { %p344_p12 = scmp.lt.s32.totalorder %s342_s12, %s338_s11 }
 0x207   :  { %p345_p13 = por %p344_p12, %p343_p11 }
 0x209   :  { %p346_p0 = pnand %p345_p13, %p339_p10 }
 0x20b   :  { %349 = shalt.err (!%p346_p0)
}
 0x20c   :  { %s350_s14 = scalar_lea.hbm %s479_s5, 32 }
 0x20d   :  { %p351_p1 = scmp.ne.s32.totalorder %s479_s5, %s350_s14  ;;  %p354_p2 = scmp.lt.u32.totalorder %s350_s14, %s479_s5 }
 0x20f   :  { %p356_p3 = pnand %p354_p2, %p351_p1 }
 0x211   :  { %359 = shalt.err (!%p356_p3)
}
 0x212   :  { %217 = dma.vmem_to_hbm [thread:$0]  %s212_s10, 32, %s479_s5, [#allocation4], %s370_s17, %s370_s17, %s371_s18  }
 0x213   :  { %364 = dma.done.wait [#allocation4], 256  }
 0x214   :  { %365 = vsyncadd [#allocation4], 4294967040 }
 0x215   :  { %221 = vsyncpa [#allocation3], 1 }
 0x216   :  { %222 = vsyncpa [#allocation6], 1 }
 0x217   :  { %223 = vsyncpa [#allocation4], 1 }

// kernel: tpu_custom_call.1
= control target key start
LH: loop header
LB: loop body
LE: loop exit
PB: predicated region body
PF: predicated region fallthrough
CT: control target
= control target key end

     0   :  { %10 = vsyncpa [#allocation3], 0  ;;  %s474_s0 = inlined_call_operand.hbm [shape: f32[2,32], index: 0, kind: input, shape index: {}]   ;;  %s475_s1 = inlined_call_operand.hbm [shape: bf16[32,32], index: 1, kind: input, shape index: {}]   ;;  %s476_s2 = inlined_call_operand.vmem [shape: f32[1,32], index: 2, kind: input, shape index: {}]   ;;  %s477_s3 = inlined_call_operand.hbm [shape: bf16[32,128], index: 3, kind: input, shape index: {}]   ;;  %s478_s4 = inlined_call_operand.vmem [shape: f32[1,128], index: 4, kind: input, shape index: {}]   ;;  %s479_s5 = inlined_call_operand.hbm [shape: f32[2,128], index: 5, kind: output, shape index: {}]  }
   0x1   :  { %11 = vsyncpa [#allocation6], 0 }
   0x2   :  { %12 = vsyncpa [#allocation4], 0 }
   0x3   :  { %17 = vsyncadd [#allocation3], 224  ;;  %s366_s18 = smov [#allocation5]   ;;  %s272_s22 = scalar_lea.hbm %s475_s1, 256 }
   0x4   :  { %s30_s19 = sshll.u32 %s366_s18, 4  ;;  %p273_p0 = scmp.ne.s32.totalorder %s475_s1, %s272_s22  ;;  %s31_s19 = int_to_ptr.vmem [resolvable:$true] %s30_s19 }
   0x5   :  { %p276_p1 = scmp.lt.u32.totalorder %s272_s22, %s475_s1 }
   0x7   :  { %p278_p2 = pnand %p276_p1, %p273_p0 }
   0x9   :  { %281 = shalt.err (!%p278_p2)
}
   0xa   :  { %s282_s27 = scalar_lea.vmem %s31_s19, 256  ;;  %p287_p4 = scmp.lt.s32.totalorder %s31_s19, %s31_s19 }
   0xb   :  { %p283_p3 = scmp.ne.s32.totalorder %s31_s19, %s282_s27  ;;  %p288_p5 = scmp.lt.s32.totalorder %s282_s27, %s282_s27 }
   0xd   :  { %p289_p6 = por %p288_p5, %p287_p4 }
   0xf   :  { %p290_p7 = pnand %p289_p6, %p283_p3 }
  0x11   :  { %293 = shalt.err (!%p290_p7)
}
  0x12   :  { %s367_s28 = smov 64   ;;  %s368_s29 = smov 4  }
  0x13   :  { %36 = dma.hbm_to_vmem [thread:$0]  %s475_s1, 256, %s31_s19, [#allocation6], %s367_s28, %s367_s28, %s368_s29  }
  0x14   :  { %s369_s7 = smov [#allocation2]   ;;  %s294_s11 = scalar_lea.hbm %s474_s0, 32 }
  0x15   :  { %s18_s8 = sshll.u32 %s369_s7, 4  ;;  %p295_p8 = scmp.ne.s32.totalorder %s474_s0, %s294_s11  ;;  %s19_s8 = int_to_ptr.vmem [resolvable:$true] %s18_s8 }
  0x16   :  { %p298_p9 = scmp.lt.u32.totalorder %s294_s11, %s474_s0 }
  0x18   :  { %p300_p10 = pnand %p298_p9, %p295_p8 }
  0x1a   :  { %303 = shalt.err (!%p300_p10)
}
  0x1b   :  { %s304_s16 = scalar_lea.vmem %s19_s8, 32  ;;  %s308_s1 = scalar_lea.vmem %s19_s8, 256 }
  0x1c   :  { %p305_p11 = scmp.ne.s32.totalorder %s19_s8, %s304_s16  ;;  %p309_p12 = scmp.lt.s32.totalorder %s19_s8, %s19_s8 }
  0x1d   :  { %p310_p13 = scmp.lt.s32.totalorder %s308_s1, %s304_s16 }
  0x1f   :  { %p311_p0 = por %p310_p13, %p309_p12 }
  0x21   :  { %p312_p1 = pnand %p311_p0, %p305_p11 }
  0x23   :  { %315 = shalt.err (!%p312_p1)
}
  0x24   :  { %s370_s17 = smov 32   ;;  %s371_s18 = smov 2  }
  0x25   :  { %24 = dma.hbm_to_vmem [thread:$0]  %s474_s0, 32, %s19_s8, [#allocation3], %s370_s17, %s370_s17, %s371_s18  }
  0x26   :  { %s372_s21 = smov [#allocation7]   ;;  %s316_s25 = scalar_lea.hbm %s477_s3, 256 }
  0x27   :  { %s44_s22 = sshll.u32 %s372_s21, 4  ;;  %p317_p2 = scmp.ne.s32.totalorder %s477_s3, %s316_s25  ;;  %s45_s22 = int_to_ptr.vmem [resolvable:$true] %s44_s22 }
  0x28   :  { %p320_p3 = scmp.lt.u32.totalorder %s316_s25, %s477_s3 }
  0x2a   :  { %p322_p4 = pnand %p320_p3, %p317_p2 }
  0x2c   :  { %325 = shalt.err (!%p322_p4)
}
  0x2d   :  { %s326_s7 = scalar_lea.vmem %s45_s22, 256  ;;  %p331_p6 = scmp.lt.s32.totalorder %s45_s22, %s45_s22 }
  0x2e   :  { %p327_p5 = scmp.ne.s32.totalorder %s45_s22, %s326_s7  ;;  %p332_p7 = scmp.lt.s32.totalorder %s326_s7, %s326_s7 }
  0x30   :  { %p333_p8 = por %p332_p7, %p331_p6 }
  0x32   :  { %p334_p9 = pnand %p333_p8, %p327_p5 }
  0x34   :  { %337 = shalt.err (!%p334_p9)
}
  0x35   :  { %50 = dma.hbm_to_vmem [thread:$0]  %s477_s3, 256, %s45_s22, [#allocation6], %s367_s28, %s367_s28, %s368_s29  }
  0x36   :  { %360 = dma.done.wait [#allocation3], 256  }
  0x37   :  { %361 = vsyncadd [#allocation3], 4294967040 }
  0x38   :  { %362 = dma.done.wait [#allocation6], 512  }
  0x39   :  { %363 = vsyncadd [#allocation6], 4294966784  ;;  %v373_v0 = vmov 0.0   ;;  %vm374_vm0 = vmmov 0   ;;  %v264_v1 = vld [vmem:[#allocation5] sm:$0xff]   ;;  %v265_v2 = vld [vmem:[#allocation5 + $0x8] sm:$0xff]  }
  0x3a   :  { %238 = vmatprep.subr.bf16.mxu0 %v373_v0  ;;  %242 = vmatprep.mubr.msk.bf16.mxu0 %vm374_vm0, %v373_v0  ;;  %v63_v3 = vld [vmem:[#allocation2] sm:$0xff]  ;;  %v64_v4 = vld [vmem:[#allocation2 + $0x8] sm:$0xff]  ;;  %vm89_vm1 = vcmask 261120  }
  0x3b   :  { %246 = vmatprep.subr.bf16.mxu1 %v373_v0  ;;  %250 = vmatprep.mubr.msk.bf16.mxu1 %vm374_vm0, %v373_v0  ;;  %v65_v5 = vpack.c.bf16 %v64_v4, %v63_v3  ;;  %v266_v6 = vld [vmem:[#allocation7] sm:$0xff]   ;;  %v267_v7 = vld [vmem:[#allocation7 + $0x8] sm:$0xff]  }
  0x3c   :  { %239 = vmatpush3.bf16.msra.mxu0 %v264_v1  ;;  %247 = vmatpush3.bf16.msra.mxu1 %v266_v6  ;;  %v224_v8 = vld [vmem:[%s476_s2] ss:$0 sm:$0xff] }
  0x3d   :  { %240 = vmatprep.subr.bf16.mxu0 %v373_v0  ;;  %248 = vmatprep.subr.bf16.mxu1 %v373_v0  ;;  %v228_v18 = vld [vmem:[%s478_s4] ss:$0 sm:$0xff] }
  0x40   :  { %241 = vmatpush3.bf16.msra.mxu0 %v265_v2  ;;  %249 = vmatpush3.bf16.msra.mxu1 %v267_v7 }
  0x43   :  { %243 = vmatmul.mubr.msk.bf16.vlgmr.msra.gmra.mrb[0].mxu0 %vm89_vm1, %v65_v5 }
 0x116   :  { %v127_v9 = vpop.f32.mrb[0].mxu0 }
 0x117   :  { %v128_v10 = vadd.f32 %v224_v8, %v127_v9  ;;  %v244_v11 = vpop.f32.mrb[1].mxu0 }
 0x118   :  { %v130_v12 = vpop.f32.mrb[2].mxu0 }
 0x119   :  { %v131_v13 = vadd.f32 %v224_v8, %v130_v12  ;;  %v245_v14 = vpop.f32.mrb[3].mxu0  ;;  %268 = vtanh.f32 %v128_v10 }
 0x11b   :  { %270 = vtanh.f32 %v131_v13 }
 0x123   :  { %v269_v15 = vpop.eup %268 }
 0x125   :  { %v271_v16 = vpop.eup %270 }
 0x126   :  { %v136_v17 = vpack.c.bf16 %v271_v16, %v269_v15 }
 0x128   :  { %251 = vmatmul.mubr.msk.bf16.vlgmr.msra.gmra.mrb[0].mxu1 %vm89_vm1, %v136_v17 }
 0x1fb   :  { %v197_v19 = vpop.f32.mrb[0].mxu1 }
 0x1fc   :  { %v198_v20 = vadd.f32 %v228_v18, %v197_v19  ;;  %v252_v21 = vpop.f32.mrb[1].mxu1 }
 0x1fd   :  { %v200_v22 = vpop.f32.mrb[2].mxu1 }
 0x1fe   :  { %204 = vst [vmem:[#allocation8] sm:$0xff] %v198_v20  ;;  %v201_v23 = vadd.f32 %v228_v18, %v200_v22  ;;  %v253_v24 = vpop.f32.mrb[3].mxu1 }
 0x200   :  { %205 = vst [vmem:[#allocation8 + $0x8] sm:$0xff] %v201_v23 }
 0x201   :  { %210 = vsyncadd [#allocation4], 224  ;;  %s375_s2 = smov [#allocation8]  }
 0x202   :  { %s211_s10 = sshll.u32 %s375_s2, 4  ;;  %s212_s10 = int_to_ptr.vmem [resolvable:$true] %s211_s10 }
 0x203   :  { %s338_s11 = scalar_lea.vmem %s212_s10, 32  ;;  %s342_s12 = scalar_lea.vmem %s212_s10, 256 }
 0x204   :  { %p339_p10 = scmp.ne.s32.totalorder %s212_s10, %s338_s11  ;;  %p343_p11 = scmp.lt.s32.totalorder %s212_s10, %s212_s10 }
 0x205   :  { %p344_p12 = scmp.lt.s32.totalorder %s342_s12, %s338_s11 }
 0x207   :  { %p345_p13 = por %p344_p12, %p343_p11 }
 0x209   :  { %p346_p0 = pnand %p345_p13, %p339_p10 }
 0x20b   :  { %349 = shalt.err (!%p346_p0)
}
 0x20c   :  { %s350_s14 = scalar_lea.hbm %s479_s5, 32 }
 0x20d   :  { %p351_p1 = scmp.ne.s32.totalorder %s479_s5, %s350_s14  ;;  %p354_p2 = scmp.lt.u32.totalorder %s350_s14, %s479_s5 }
 0x20f   :  { %p356_p3 = pnand %p354_p2, %p351_p1 }
 0x211   :  { %359 = shalt.err (!%p356_p3)
}
 0x212   :  { %217 = dma.vmem_to_hbm [thread:$0]  %s212_s10, 32, %s479_s5, [#allocation4], %s370_s17, %s370_s17, %s371_s18  }
 0x213   :  { %364 = dma.done.wait [#allocation4], 256  }
 0x214   :  { %365 = vsyncadd [#allocation4], 4294967040 }
 0x215   :  { %221 = vsyncpa [#allocation3], 1 }
 0x216   :  { %222 = vsyncpa [#allocation6], 1 }
 0x217   :  { %223 = vsyncpa [#allocation4], 1 }

</bundles_post_ra>
